<compile_context>
chip_gen: v7x
topology: tpu7x:2x2x1
jax: 0.10.0
libtpu: 0.0.40
codegen_flags: <defaults>
</compile_context>

<pallas_src>
import functools

import jax
import jax.numpy as jnp
from jax.experimental import pallas as pl
from jax.experimental.pallas import tpu as pltpu

_NUM_CLASSES = 2
_LANES = 128
_FOLD_SUBLANES = 8            # accumulator shape = (8, 128) f32
_MAX_BLOCK_ROWS = 4096        # 4096 x 128 f32 = 2 MiB per operand per buffer
_VMEM_LIMIT = 32 * 1024 * 1024


def _sublane_unit(dtype):
    """Minimum legal sublane multiple for a block of this dtype."""
    itemsize = jnp.dtype(dtype).itemsize
    if itemsize == 1:
        return 32
    if itemsize == 2:
        return 16
    return 8


# --------------------------------------------------------------------------------------
# Kernels
# --------------------------------------------------------------------------------------

def _sums_kernel(x_ref, t_ref, tp_ref, fp_ref, fn_ref, *, tm):
    """Generic path: x and t are (tm, 128) blocks of two same-length flat streams.

    Accumulates tp = sum(x*t), fp = sum((1-t)*x), fn = sum(t*(1-x)) into per-parallel-
    shard (8, 128) f32 lane-vector accumulators (VPU adds only; no cross-lane reduce).
    """
    k = pl.program_id(1)

    @pl.when(k == 0)
    def _init():
        tp_ref[...] = jnp.zeros_like(tp_ref)
        fp_ref[...] = jnp.zeros_like(fp_ref)
        fn_ref[...] = jnp.zeros_like(fn_ref)

    x = x_ref[...].astype(jnp.float32)
    t = t_ref[...].astype(jnp.float32)
    xt = x * t

    def fold(v):
        # (tm, 128) -> (8, 128): layout-preserving sum over whole (8,128) vregs.
        return v.reshape(tm // _FOLD_SUBLANES, _FOLD_SUBLANES, _LANES).sum(axis=0)

    # fp/fn accumulated elementwise (torch's formulation) instead of sum(x)-tp /
    # sum(t)-tp, so the final Tversky ratio can never exceed 1 through cancellation.
    tp_ref[...] += fold(xt)
    fp_ref[...] += fold(x - xt)
    fn_ref[...] += fold(t - xt)


def _label_sums_kernel(x_ref, lab_ref, tp_ref, fp_ref, fn_ref, *, tm, num_classes):
    """Fused integer-label path: one-hot is computed on the fly, never materialized.

    x_ref:   (1, C, tm, 128) prediction block (both class planes, same pixels)
    lab_ref: (1, tm, 128)    int32 label block for the same pixels
    """
    k = pl.program_id(1)

    @pl.when(k == 0)
    def _init():
        tp_ref[...] = jnp.zeros_like(tp_ref)
        fp_ref[...] = jnp.zeros_like(fp_ref)
        fn_ref[...] = jnp.zeros_like(fn_ref)

    lab = lab_ref[0]  # (tm, 128) int32
    xt_sum = jnp.zeros((tm, _LANES), jnp.float32)
    x_sum = jnp.zeros((tm, _LANES), jnp.float32)
    t_sum = jnp.zeros((tm, _LANES), jnp.float32)
    for c in range(num_classes):          # static (C == 2) loop
        x_c = x_ref[0, c].astype(jnp.float32)
        t_c = (lab == c).astype(jnp.float32)
        xt_sum = xt_sum + x_c * t_c
        x_sum = x_sum + x_c
        t_sum = t_sum + t_c

    def fold(v):
        return v.reshape(tm // _FOLD_SUBLANES, _FOLD_SUBLANES, _LANES).sum(axis=0)

    tp_ref[...] += fold(xt_sum)
    fp_ref[...] += fold(x_sum - xt_sum)   # sum_c (1 - t_c) * x_c
    fn_ref[...] += fold(t_sum - xt_sum)   # sum_c t_c * (1 - x_c)


# --------------------------------------------------------------------------------------
# Wrapper-side partial sums (tails / tiny-input fallbacks)
# --------------------------------------------------------------------------------------

def _partial_sums_jnp(x, t):
    x = x.reshape(-1).astype(jnp.float32)
    t = t.reshape(-1).astype(jnp.float32)
    xt = x * t
    return jnp.sum(xt), jnp.sum(x - xt), jnp.sum(t - xt)


def _partial_sums_labels_jnp(x, lab, num_classes=_NUM_CLASSES):
    # x: (B, C, P) predictions, lab: (B, P) integer labels (P may be 0).
    x = x.astype(jnp.float32)
    t = jax.nn.one_hot(lab, num_classes, axis=1, dtype=jnp.float32)  # (B, C, P)
    xt = x * t
    return jnp.sum(xt), jnp.sum(x - xt), jnp.sum(t - xt)


# --------------------------------------------------------------------------------------
# Streaming reductions
# --------------------------------------------------------------------------------------

def _reduce_sums_2d(x_flat, t_flat, max_block_rows):
    """(tp, fp, fn) for two equal-length flat streams (native dtypes, upcast in-vreg)."""
    # 64-bit dtypes are not streamed through the kernel (rare; x64 is off by default).
    if jnp.dtype(x_flat.dtype).itemsize > 4:
        x_flat = x_flat.astype(jnp.float32)
    if jnp.dtype(t_flat.dtype).itemsize > 4:
        t_flat = t_flat.astype(jnp.float32)

    n = x_flat.shape[0]
    unit = max(_sublane_unit(x_flat.dtype), _sublane_unit(t_flat.dtype))
    rows128 = n // _LANES
    lane_tail = n - rows128 * _LANES

    if rows128 >= unit:
        if rows128 <= max_block_rows:
            tm = (rows128 // unit) * unit
            nb = 1
        else:
            tm = max((max_block_rows // unit) * unit, unit)
            nb = rows128 // tm
            if nb >= 3 and nb % 2 == 1:
                nb -= 1            # keep the block count even so the 2-way split is exact
    else:
        tm, nb = 0, 0
    body_rows = tm * nb
    body_elems = body_rows * _LANES

    if body_rows == 0:
        # Input too small for even one (unit, 128) block -> plain jnp.
        return _partial_sums_jnp(x_flat, t_flat)

    if lane_tail == 0:
        # Free reshape; the kernel simply never reads the uncovered trailing rows.
        x2 = x_flat.reshape(rows128, _LANES)
        t2 = t_flat.reshape(rows128, _LANES)
    else:
        # Rare misaligned case: one slice-copy of the body (cheaper than padding the
        # whole array, and keeps the kernel hot loop mask-free).
        x2 = x_flat[:body_elems].reshape(body_rows, _LANES)
        t2 = t_flat[:body_elems].reshape(body_rows, _LANES)

    # Leading "parallel" axis: v7x's two TensorCores each stream half of HBM; a
    # harmless serial loop on single-core v5e/v6e.
    # TODO(synk): if profiling shows plain "parallel" is not core-sharded on v7x,
    # switch this axis to pltpu.CORE_PARALLEL; cannot be verified in this environment.
    p_ax = 2 if nb >= 2 else 1
    k_ax = nb // p_ax

    def in_map(p, k):
        return (p * k_ax + k, 0)

    out_shape = jax.ShapeDtypeStruct((p_ax, _FOLD_SUBLANES, _LANES), jnp.float32)
    out_spec = pl.BlockSpec((None, _FOLD_SUBLANES, _LANES), lambda p, k: (p, 0, 0))

    tp_p, fp_p, fn_p = pl.pallas_call(
        functools.partial(_sums_kernel, tm=tm),
        out_shape=(out_shape, out_shape, out_shape),
        grid_spec=pltpu.PrefetchScalarGridSpec(
            num_scalar_prefetch=0,
            grid=(p_ax, k_ax),
            in_specs=[
                pl.BlockSpec((tm, _LANES), in_map),
                pl.BlockSpec((tm, _LANES), in_map),
            ],
            out_specs=[out_spec, out_spec, out_spec],
        ),
        compiler_params=pltpu.CompilerParams(
            dimension_semantics=("parallel", "arbitrary"),
            vmem_limit_bytes=_VMEM_LIMIT),
    )(x2, t2)

    tail_tp, tail_fp, tail_fn = _partial_sums_jnp(
        x_flat[body_elems:], t_flat[body_elems:])
    return (jnp.sum(tp_p) + tail_tp,
            jnp.sum(fp_p) + tail_fp,
            jnp.sum(fn_p) + tail_fn)


def _label_path_sums(inputs, labels, max_block_rows):
    """(tp, fp, fn) for integer labels: one-hot fused into the kernel."""
    B, C, H, W = inputs.shape
    npix = H * W

    if npix % _LANES != 0 or jnp.dtype(inputs.dtype).itemsize > 4:
        # Rare fallback: materialize the aligned one-hot as int8 (kernel upcasts in-vreg;
        # the sublane-unit logic keeps the int8 BlockSpec legal) and stream generically.
        onehot = jax.nn.one_hot(labels, C, axis=1, dtype=jnp.int8)
        return _reduce_sums_2d(inputs.reshape(-1), onehot.reshape(-1), max_block_rows)

    labels = labels.astype(jnp.int32)     # no-op for the common int32 case
    R = npix // _LANES
    unit = max(_sublane_unit(inputs.dtype), _FOLD_SUBLANES)

    if R >= unit:
        if R <= max_block_rows:
            tm = (R // unit) * unit
            nkb = 1
        else:
            tm = max((max_block_rows // unit) * unit, unit)
            nkb = R // tm
        covered = tm * nkb
    else:
        covered = 0

    xr = inputs.reshape(B, C, npix)
    lr = labels.reshape(B, npix)

    if covered == 0:
        return _partial_sums_labels_jnp(xr, lr, C)

    x4 = xr.reshape(B, C, R, _LANES)      # free reshapes (contiguous splits)
    l3 = lr.reshape(B, R, _LANES)

    out_shape = jax.ShapeDtypeStruct((B, _FOLD_SUBLANES, _LANES), jnp.float32)
    out_spec = pl.BlockSpec((None, _FOLD_SUBLANES, _LANES), lambda b, k: (b, 0, 0))

    tp_p, fp_p, fn_p = pl.pallas_call(
        functools.partial(_label_sums_kernel, tm=tm, num_classes=C),
        out_shape=(out_shape, out_shape, out_shape),
        grid_spec=pltpu.PrefetchScalarGridSpec(
            num_scalar_prefetch=0,
            grid=(B, nkb),
            in_specs=[
                pl.BlockSpec((1, C, tm, _LANES), lambda b, k: (b, 0, k, 0)),
                pl.BlockSpec((1, tm, _LANES), lambda b, k: (b, k, 0)),
            ],
            out_specs=[out_spec, out_spec, out_spec],
        ),
        compiler_params=pltpu.CompilerParams(
            dimension_semantics=("parallel", "arbitrary"),
            vmem_limit_bytes=_VMEM_LIMIT),
    )(x4, l3)

    covered_pix = covered * _LANES
    tail_tp, tail_fp, tail_fn = _partial_sums_labels_jnp(
        xr[:, :, covered_pix:], lr[:, covered_pix:], C)
    return (jnp.sum(tp_p) + tail_tp,
            jnp.sum(fp_p) + tail_fp,
            jnp.sum(fn_p) + tail_fn)


# --------------------------------------------------------------------------------------
# Public loss
# --------------------------------------------------------------------------------------

def focal_tversky_loss(inputs, target, *, alpha_t=0.7, beta_t=0.3,
                       gamma_f=4.0 / 3.0, smooth=1e-6,
                       max_block_rows=_MAX_BLOCK_ROWS):
    """Mirrors FocalTverskyLoss.forward.

    inputs: (B, C, H, W) predictions (NCHW, like the PyTorch module), C == 2
    target: (B, C, H, W) one-hot / float probabilities, or (B, H, W) integer labels
    """
    # TODO(synk): the torch module only *prints* on non-finite inputs; that diagnostic
    # print is omitted here (it would cost an extra full HBM pass and does not affect
    # the returned value).
    if inputs.shape[1] != _NUM_CLASSES:
        raise ValueError(
            "Predictions must be a logit tensor with the last dimension shape "
            "beeing equal to the number of classes")

    if target.ndim != inputs.ndim:
        # Integer labels (B, H, W): one-hot is fused into the kernel.
        # TODO(synk): torch literally permutes the (B,H,W,C) one-hot by (0,2,3,1),
        # yielding a (B,W,C,H) tensor misaligned with its NHWC inputs; we implement
        # the (presumably intended) aligned computation instead.
        tp, fp, fn = _label_path_sums(inputs, target, max_block_rows)
    else:
        # Both tensors are permuted identically in torch before flattening; the three
        # global sums are permutation-invariant, so we stream the native-layout,
        # native-dtype tensors directly (kernel upcasts in-vreg).
        tp, fp, fn = _reduce_sums_2d(inputs.reshape(-1), target.reshape(-1),
                                     max_block_rows)

    tversky = (tp + smooth) / (tp + alpha_t * fn + beta_t * fp + smooth)
    return (1.0 - tversky) ** gamma_f


# --------------------------------------------------------------------------------------
# Reference + self-test
# --------------------------------------------------------------------------------------

def _reference(inputs, target, alpha_t=0.7, beta_t=0.3, gamma_f=4.0 / 3.0,
               smooth=1e-6):
    """Pure-jnp reference mirroring the torch math (aligned one-hot path)."""
    x = jnp.transpose(inputs, (0, 2, 3, 1)).reshape(-1).astype(jnp.float32)
    t = jnp.transpose(target, (0, 2, 3, 1)).reshape(-1).astype(jnp.float32)
    tp = jnp.sum(x * t)
    fp = jnp.sum((1.0 - t) * x)
    fn = jnp.sum(t * (1.0 - x))
    tversky = (tp + smooth) / (tp + alpha_t * fn + beta_t * fp + smooth)
    return (1.0 - tversky) ** gamma_f


if __name__ == "__main__":
    key = jax.random.PRNGKey(0)
    ks = jax.random.split(key, 5)
    C = _NUM_CLASSES

    def make_case(k, B, H, W):
        k1, k2 = jax.random.split(k)
        logits = jax.random.normal(k1, (B, C, H, W), dtype=jnp.float32)
        preds = jax.nn.softmax(logits, axis=1)                 # per-class probabilities
        labels = jax.random.randint(k2, (B, H, W), 0, C, dtype=jnp.int32)
        onehot = jnp.transpose(
            jax.nn.one_hot(labels, C, dtype=jnp.float32), (0, 3, 1, 2))  # NCHW one-hot
        return preds, labels, onehot

    def check(got, want, name):
        got = jax.block_until_ready(got)
        assert jnp.allclose(got, want, rtol=2e-4, atol=1e-6), (name, got, want)

    # 1) small one-hot-target path (single-block generic kernel); tiny-label jnp fallback
    preds, labels, onehot = make_case(ks[0], 2, 16, 16)
    ref = _reference(preds, onehot)
    check(focal_tversky_loss(preds, onehot), ref, "onehot_small")
    check(focal_tversky_loss(preds, labels), ref, "labels_tiny_fallback")

    # 2) integer-label path with the fused one-hot kernel; int8 one-hot target streaming
    preds, labels, onehot = make_case(ks[1], 2, 32, 32)
    ref = _reference(preds, onehot)
    check(focal_tversky_loss(preds, labels), ref, "labels_fused")
    check(focal_tversky_loss(preds, onehot), ref, "onehot_f32")
    check(focal_tversky_loss(preds, onehot.astype(jnp.int8)), ref, "onehot_int8")

    # 3) multi-block generic path: 2-way parallel split + k accumulation + row tail
    preds, labels, onehot = make_case(ks[2], 2, 192, 192)
    ref = _reference(preds, onehot)
    check(focal_tversky_loss(preds, onehot), ref, "onehot_default_block")
    check(focal_tversky_loss(preds, onehot, max_block_rows=128), ref, "onehot_multiblock")

    # 4) multi-block fused label path with per-plane row tail
    preds, labels, onehot = make_case(ks[3], 2, 48, 48)
    ref = _reference(preds, onehot)
    check(focal_tversky_loss(preds, labels, max_block_rows=8), ref, "labels_multiblock_tail")

    # 5) lane-misaligned shape (H*W % 128 != 0): slice-copy body + element tail;
    #    label path falls back to the int8 one-hot generic stream.
    preds, labels, onehot = make_case(ks[4], 2, 7, 37)
    ref = _reference(preds, onehot)
    check(focal_tversky_loss(preds, onehot), ref, "onehot_misaligned")
    check(focal_tversky_loss(preds, labels), ref, "labels_misaligned_fallback")

    print("KERNEL_OK")
</pallas_src>

<mosaic_0001>
module attributes {stable_mosaic.version = 11 : i64} {
  func.func @_sums_kernel(%arg0: i32, %arg1: i32, %arg2: memref<8x128xf32, #tpu.memory_space<vmem>>, %arg3: memref<8x128xf32, #tpu.memory_space<vmem>>, %arg4: memref<1x8x128xf32, #tpu.memory_space<vmem>>, %arg5: memref<1x8x128xf32, #tpu.memory_space<vmem>>, %arg6: memref<1x8x128xf32, #tpu.memory_space<vmem>>) attributes {dimension_semantics = [#tpu.dimension_semantics<parallel>, #tpu.dimension_semantics<arbitrary>], iteration_bounds = array<i64: 1, 1>, scalar_prefetch = 0 : i64, scratch_operands = 0 : i64, tpu.core_type = #tpu.core_type<tc>, window_params = [{transform_indices = @transform_0, window_bounds = array<i64: 8, 128>}, {transform_indices = @transform_1, window_bounds = array<i64: 8, 128>}, {transform_indices = @transform_2, window_bounds = array<i64: 1, 8, 128>}, {transform_indices = @transform_3, window_bounds = array<i64: 1, 8, 128>}, {transform_indices = @transform_4, window_bounds = array<i64: 1, 8, 128>}]} {
    %c0_i32 = arith.constant 0 : i32
    %0 = arith.cmpi eq, %arg1, %c0_i32 : i32
    %1 = arith.extui %0 : i1 to i32
    %c0_i32_0 = arith.constant 0 : i32
    %2 = arith.cmpi ne, %1, %c0_i32_0 : i32
    scf.if %2 {
      %cst_24 = arith.constant 0.000000e+00 : f32
      %32 = vector.broadcast %cst_24 : f32 to vector<8x128xf32>
      %c0_25 = arith.constant 0 : index
      %c0_26 = arith.constant 0 : index
      %c0_27 = arith.constant 0 : index
      %33 = vector.load %arg4[%c0_25, %c0_26, %c0_27] : memref<1x8x128xf32, #tpu.memory_space<vmem>>, vector<1x8x128xf32>
      %34 = vector.shape_cast %33 : vector<1x8x128xf32> to vector<8x128xf32>
      %35 = vector.shape_cast %32 : vector<8x128xf32> to vector<1x8x128xf32>
      tpu.vector_store %arg4[%c0_25, %c0_26, %c0_27], %35 {strides = array<i32>} : memref<1x8x128xf32, #tpu.memory_space<vmem>>, vector<1x8x128xf32>,
      %cst_28 = arith.constant 0.000000e+00 : f32
      %36 = vector.broadcast %cst_28 : f32 to vector<8x128xf32>
      %c0_29 = arith.constant 0 : index
      %c0_30 = arith.constant 0 : index
      %c0_31 = arith.constant 0 : index
      %37 = vector.load %arg5[%c0_29, %c0_30, %c0_31] : memref<1x8x128xf32, #tpu.memory_space<vmem>>, vector<1x8x128xf32>
      %38 = vector.shape_cast %37 : vector<1x8x128xf32> to vector<8x128xf32>
      %39 = vector.shape_cast %36 : vector<8x128xf32> to vector<1x8x128xf32>
      tpu.vector_store %arg5[%c0_29, %c0_30, %c0_31], %39 {strides = array<i32>} : memref<1x8x128xf32, #tpu.memory_space<vmem>>, vector<1x8x128xf32>,
      %cst_32 = arith.constant 0.000000e+00 : f32
      %40 = vector.broadcast %cst_32 : f32 to vector<8x128xf32>
      %c0_33 = arith.constant 0 : index
      %c0_34 = arith.constant 0 : index
      %c0_35 = arith.constant 0 : index
      %41 = vector.load %arg6[%c0_33, %c0_34, %c0_35] : memref<1x8x128xf32, #tpu.memory_space<vmem>>, vector<1x8x128xf32>
      %42 = vector.shape_cast %41 : vector<1x8x128xf32> to vector<8x128xf32>
      %43 = vector.shape_cast %40 : vector<8x128xf32> to vector<1x8x128xf32>
      tpu.vector_store %arg6[%c0_33, %c0_34, %c0_35], %43 {strides = array<i32>} : memref<1x8x128xf32, #tpu.memory_space<vmem>>, vector<1x8x128xf32>,
    } else {
    }
    %c0 = arith.constant 0 : index
    %c0_1 = arith.constant 0 : index
    %3 = vector.load %arg2[%c0, %c0_1] : memref<8x128xf32, #tpu.memory_space<vmem>>, vector<8x128xf32>
    %c0_2 = arith.constant 0 : index
    %c0_3 = arith.constant 0 : index
    %4 = vector.load %arg3[%c0_2, %c0_3] : memref<8x128xf32, #tpu.memory_space<vmem>>, vector<8x128xf32>
    %5 = arith.mulf %3, %4 : vector<8x128xf32>
    %c0_4 = arith.constant 0 : index
    %c0_5 = arith.constant 0 : index
    %c0_6 = arith.constant 0 : index
    %6 = vector.load %arg4[%c0_4, %c0_5, %c0_6] : memref<1x8x128xf32, #tpu.memory_space<vmem>>, vector<1x8x128xf32>
    %7 = vector.shape_cast %6 : vector<1x8x128xf32> to vector<8x128xf32>
    %8 = vector.shape_cast %5 : vector<8x128xf32> to vector<1x8x128xf32>
    %cst = arith.constant dense<0.000000e+00> : vector<8x128xf32>
    %9 = vector.multi_reduction <add>, %8, %cst [0] : vector<1x8x128xf32> to vector<8x128xf32>
    %10 = arith.addf %7, %9 : vector<8x128xf32>
    %c0_7 = arith.constant 0 : index
    %c0_8 = arith.constant 0 : index
    %c0_9 = arith.constant 0 : index
    %11 = vector.load %arg4[%c0_7, %c0_8, %c0_9] : memref<1x8x128xf32, #tpu.memory_space<vmem>>, vector<1x8x128xf32>
    %12 = vector.shape_cast %11 : vector<1x8x128xf32> to vector<8x128xf32>
    %13 = vector.shape_cast %10 : vector<8x128xf32> to vector<1x8x128xf32>
    tpu.vector_store %arg4[%c0_7, %c0_8, %c0_9], %13 {strides = array<i32>} : memref<1x8x128xf32, #tpu.memory_space<vmem>>, vector<1x8x128xf32>,
    %c0_10 = arith.constant 0 : index
    %c0_11 = arith.constant 0 : index
    %c0_12 = arith.constant 0 : index
    %14 = vector.load %arg5[%c0_10, %c0_11, %c0_12] : memref<1x8x128xf32, #tpu.memory_space<vmem>>, vector<1x8x128xf32>
    %15 = vector.shape_cast %14 : vector<1x8x128xf32> to vector<8x128xf32>
    %16 = arith.subf %3, %5 : vector<8x128xf32>
    %17 = vector.shape_cast %16 : vector<8x128xf32> to vector<1x8x128xf32>
    %cst_13 = arith.constant dense<0.000000e+00> : vector<8x128xf32>
    %18 = vector.multi_reduction <add>, %17, %cst_13 [0] : vector<1x8x128xf32> to vector<8x128xf32>
    %19 = arith.addf %15, %18 : vector<8x128xf32>
    %c0_14 = arith.constant 0 : index
    %c0_15 = arith.constant 0 : index
    %c0_16 = arith.constant 0 : index
    %20 = vector.load %arg5[%c0_14, %c0_15, %c0_16] : memref<1x8x128xf32, #tpu.memory_space<vmem>>, vector<1x8x128xf32>
    %21 = vector.shape_cast %20 : vector<1x8x128xf32> to vector<8x128xf32>
    %22 = vector.shape_cast %19 : vector<8x128xf32> to vector<1x8x128xf32>
    tpu.vector_store %arg5[%c0_14, %c0_15, %c0_16], %22 {strides = array<i32>} : memref<1x8x128xf32, #tpu.memory_space<vmem>>, vector<1x8x128xf32>,
    %c0_17 = arith.constant 0 : index
    %c0_18 = arith.constant 0 : index
    %c0_19 = arith.constant 0 : index
    %23 = vector.load %arg6[%c0_17, %c0_18, %c0_19] : memref<1x8x128xf32, #tpu.memory_space<vmem>>, vector<1x8x128xf32>
    %24 = vector.shape_cast %23 : vector<1x8x128xf32> to vector<8x128xf32>
    %25 = arith.subf %4, %5 : vector<8x128xf32>
    %26 = vector.shape_cast %25 : vector<8x128xf32> to vector<1x8x128xf32>
    %cst_20 = arith.constant dense<0.000000e+00> : vector<8x128xf32>
    %27 = vector.multi_reduction <add>, %26, %cst_20 [0] : vector<1x8x128xf32> to vector<8x128xf32>
    %28 = arith.addf %24, %27 : vector<8x128xf32>
    %c0_21 = arith.constant 0 : index
    %c0_22 = arith.constant 0 : index
    %c0_23 = arith.constant 0 : index
    %29 = vector.load %arg6[%c0_21, %c0_22, %c0_23] : memref<1x8x128xf32, #tpu.memory_space<vmem>>, vector<1x8x128xf32>
    %30 = vector.shape_cast %29 : vector<1x8x128xf32> to vector<8x128xf32>
    %31 = vector.shape_cast %28 : vector<8x128xf32> to vector<1x8x128xf32>
    tpu.vector_store %arg6[%c0_21, %c0_22, %c0_23], %31 {strides = array<i32>} : memref<1x8x128xf32, #tpu.memory_space<vmem>>, vector<1x8x128xf32>,
    return
  }
  func.func @transform_0(%arg0: i32, %arg1: i32) -> (i32, i32) {
    %c1_i32 = arith.constant 1 : i32
    %0 = arith.muli %arg0, %c1_i32 : i32
    %1 = arith.addi %0, %arg1 : i32
    %c0_i32 = arith.constant 0 : i32
    %c0_i32_0 = arith.constant 0 : i32
    return %1, %c0_i32 : i32, i32
  }
  func.func @transform_1(%arg0: i32, %arg1: i32) -> (i32, i32) {
    %c1_i32 = arith.constant 1 : i32
    %0 = arith.muli %arg0, %c1_i32 : i32
    %1 = arith.addi %0, %arg1 : i32
    %c0_i32 = arith.constant 0 : i32
    %c0_i32_0 = arith.constant 0 : i32
    return %1, %c0_i32 : i32, i32
  }
  func.func @transform_2(%arg0: i32, %arg1: i32) -> (i32, i32, i32) {
    %c0_i32 = arith.constant 0 : i32
    %c0_i32_0 = arith.constant 0 : i32
    %c0_i32_1 = arith.constant 0 : i32
    return %arg0, %c0_i32, %c0_i32_0 : i32, i32, i32
  }
  func.func @transform_3(%arg0: i32, %arg1: i32) -> (i32, i32, i32) {
    %c0_i32 = arith.constant 0 : i32
    %c0_i32_0 = arith.constant 0 : i32
    %c0_i32_1 = arith.constant 0 : i32
    return %arg0, %c0_i32, %c0_i32_0 : i32, i32, i32
  }
  func.func @transform_4(%arg0: i32, %arg1: i32) -> (i32, i32, i32) {
    %c0_i32 = arith.constant 0 : i32
    %c0_i32_0 = arith.constant 0 : i32
    %c0_i32_1 = arith.constant 0 : i32
    return %arg0, %c0_i32, %c0_i32_0 : i32, i32, i32
  }
}

</mosaic_0001>

<bundles_post_ra>
// kernel: tpu_custom_call.1
= control target key start
LH: loop header
LB: loop body
LE: loop exit
PB: predicated region body
PF: predicated region fallthrough
CT: control target
= control target key end

     0   :  { %10 = vsyncpa [#allocation3], 0  ;;  %s343_s0 = inlined_call_operand.hbm [shape: f32[8,128], index: 0, kind: input, shape index: {}]   ;;  %s344_s1 = inlined_call_operand.hbm [shape: f32[8,128], index: 1, kind: input, shape index: {}]   ;;  %s345_s2 = inlined_call_operand.hbm [shape: f32[1,8,128], index: 2, kind: output, shape index: {0}]   ;;  %s346_s3 = inlined_call_operand.hbm [shape: f32[1,8,128], index: 3, kind: output, shape index: {1}]   ;;  %s347_s4 = inlined_call_operand.hbm [shape: f32[1,8,128], index: 4, kind: output, shape index: {2}]  }
   0x1   :  { %11 = vsyncpa [#allocation6], 0 }
   0x2   :  { %12 = vsyncpa [#allocation4], 0 }
   0x3   :  { %13 = vsyncpa [#allocation9], 0  ;;  %s239_s15 = smov [#allocation2]   ;;  %s240_s17 = smov [#allocation5]  }
   0x4   :  { %s23_s16 = sshll.u32 %s239_s15, 4  ;;  %s36_s18 = sshll.u32 %s240_s17, 4  ;;  %s24_s16 = int_to_ptr.vmem [resolvable:$true] %s23_s16  ;;  %s37_s18 = int_to_ptr.vmem [resolvable:$true] %s36_s18 }
   0x5   :  { %s121_s21 = scalar_lea.hbm %s343_s0, 128 }
   0x6   :  { %p122_p0 = scmp.ne.s32.totalorder %s343_s0, %s121_s21  ;;  %p125_p1 = scmp.lt.u32.totalorder %s121_s21, %s343_s0 }
   0x8   :  { %p127_p2 = pnand %p125_p1, %p122_p0 }
   0xa   :  { %130 = shalt.err (!%p127_p2)
}
   0xb   :  { %s131_s26 = scalar_lea.vmem %s24_s16, 128  ;;  %p136_p4 = scmp.lt.s32.totalorder %s24_s16, %s24_s16 }
   0xc   :  { %p132_p3 = scmp.ne.s32.totalorder %s24_s16, %s131_s26  ;;  %p137_p5 = scmp.lt.s32.totalorder %s131_s26, %s131_s26 }
   0xe   :  { %p138_p6 = por %p137_p5, %p136_p4 }
  0x10   :  { %p139_p7 = pnand %p138_p6, %p132_p3 }
  0x12   :  { %142 = shalt.err (!%p139_p7)
}
  0x13   :  { %26 = dma.hbm_to_vmem [thread:$0]  %s343_s0, 128, %s24_s16, [#allocation3]  }
  0x14   :  { %s143_s5 = scalar_lea.hbm %s344_s1, 128 }
  0x15   :  { %p144_p8 = scmp.ne.s32.totalorder %s344_s1, %s143_s5  ;;  %p147_p9 = scmp.lt.u32.totalorder %s143_s5, %s344_s1 }
  0x17   :  { %p149_p10 = pnand %p147_p9, %p144_p8 }
  0x19   :  { %152 = shalt.err (!%p149_p10)
}
  0x1a   :  { %s153_s10 = scalar_lea.vmem %s37_s18, 128  ;;  %p158_p12 = scmp.lt.s32.totalorder %s37_s18, %s37_s18 }
  0x1b   :  { %p154_p11 = scmp.ne.s32.totalorder %s37_s18, %s153_s10  ;;  %p159_p13 = scmp.lt.s32.totalorder %s153_s10, %s153_s10 }
  0x1d   :  { %p160_p0 = por %p159_p13, %p158_p12 }
  0x1f   :  { %p161_p1 = pnand %p160_p0, %p154_p11 }
  0x21   :  { %164 = shalt.err (!%p161_p1)
}
  0x22   :  { %39 = dma.hbm_to_vmem [thread:$0]  %s344_s1, 128, %s37_s18, [#allocation6]  }
  0x23   :  { %231 = dma.done.wait [#allocation3], 128  }
  0x24   :  { %232 = vsyncadd [#allocation3], 4294967168 }
  0x25   :  { %233 = dma.done.wait [#allocation6], 128  }
  0x26   :  { %234 = vsyncadd [#allocation6], 4294967168  ;;  %v55_v0 = vld [vmem:[#allocation2] sm:$0xff]  ;;  %v56_v1 = vld [vmem:[#allocation5] sm:$0xff]  ;;  %s241_s12 = smov [#allocation7]   ;;  %s242_s14 = smov [#allocation8]  }
  0x27   :  { %s78_s13 = sshll.u32 %s241_s12, 4  ;;  %v57_v2 = vmul.f32 %v56_v1, %v55_v0  ;;  %s88_s15 = sshll.u32 %s242_s14, 4  ;;  %s79_s13 = int_to_ptr.vmem [resolvable:$true] %s78_s13  ;;  %s293_s15 = int_to_ptr.vmem [resolvable:$true] %s88_s15 }
  0x28   :  { %s243_s16 = smov [#allocation10]   ;;  %s165_s1 = scalar_lea.vmem %s79_s13, 128 }
  0x29   :  { %s98_s17 = sshll.u32 %s243_s16, 4  ;;  %v63_v3 = vsub.f32 %v55_v0, %v57_v2  ;;  %v68_v4 = vsub.f32 %v56_v1, %v57_v2  ;;  %61 = vst [vmem:[#allocation7] sm:$0xff] %v57_v2  ;;  %p166_p2 = scmp.ne.s32.totalorder %s79_s13, %s165_s1  ;;  %s295_s17 = int_to_ptr.vmem [resolvable:$true] %s98_s17 }
  0x2a   :  { %p170_p3 = scmp.lt.s32.totalorder %s79_s13, %s79_s13  ;;  %p171_p4 = scmp.lt.s32.totalorder %s165_s1, %s165_s1 }
  0x2c   :  { %p172_p5 = por %p171_p4, %p170_p3 }
  0x2e   :  { %p173_p6 = pnand %p172_p5, %p166_p2 }
  0x30   :  { %176 = shalt.err (!%p173_p6)
}
  0x31   :  { %s177_s20 = scalar_lea.hbm %s345_s2, 128 }
  0x32   :  { %p178_p7 = scmp.ne.s32.totalorder %s345_s2, %s177_s20  ;;  %p181_p8 = scmp.lt.u32.totalorder %s177_s20, %s345_s2 }
  0x34   :  { %p183_p9 = pnand %p181_p8, %p178_p7 }
  0x36   :  { %186 = shalt.err (!%p183_p9)
}
  0x37   :  { %81 = dma.vmem_to_hbm [thread:$0]  %s79_s13, 128, %s345_s2, [#allocation4]   ;;  %66 = vst [vmem:[#allocation8] sm:$0xff] %v63_v3  ;;  %71 = vst [vmem:[#allocation10] sm:$0xff] %v68_v4 }
  0x38   :  { %s187_s27 = scalar_lea.vmem %s293_s15, 128  ;;  %p192_p11 = scmp.lt.s32.totalorder %s293_s15, %s293_s15 }
  0x39   :  { %p188_p10 = scmp.ne.s32.totalorder %s293_s15, %s187_s27  ;;  %p193_p12 = scmp.lt.s32.totalorder %s187_s27, %s187_s27 }
  0x3b   :  { %p194_p13 = por %p193_p12, %p192_p11 }
  0x3d   :  { %p195_p0 = pnand %p194_p13, %p188_p10 }
  0x3f   :  { %198 = shalt.err (!%p195_p0)
}
  0x40   :  { %s199_s30 = scalar_lea.hbm %s346_s3, 128 }
  0x41   :  { %p200_p1 = scmp.ne.s32.totalorder %s346_s3, %s199_s30  ;;  %p203_p2 = scmp.lt.u32.totalorder %s199_s30, %s346_s3 }
  0x43   :  { %p205_p3 = pnand %p203_p2, %p200_p1 }
  0x45   :  { %208 = shalt.err (!%p205_p3)
}
  0x46   :  { %91 = dma.vmem_to_hbm [thread:$0]  %s293_s15, 128, %s346_s3, [#allocation9]  }
  0x47   :  { %s209_s10 = scalar_lea.vmem %s295_s17, 128  ;;  %p214_p5 = scmp.lt.s32.totalorder %s295_s17, %s295_s17 }
  0x48   :  { %p210_p4 = scmp.ne.s32.totalorder %s295_s17, %s209_s10  ;;  %p215_p6 = scmp.lt.s32.totalorder %s209_s10, %s209_s10 }
  0x4a   :  { %p216_p7 = por %p215_p6, %p214_p5 }
  0x4c   :  { %p217_p8 = pnand %p216_p7, %p210_p4 }
  0x4e   :  { %220 = shalt.err (!%p217_p8)
}
  0x4f   :  { %s221_s12 = scalar_lea.hbm %s347_s4, 128 }
  0x50   :  { %p222_p9 = scmp.ne.s32.totalorder %s347_s4, %s221_s12  ;;  %p225_p10 = scmp.lt.u32.totalorder %s221_s12, %s347_s4 }
  0x52   :  { %p227_p11 = pnand %p225_p10, %p222_p9 }
  0x54   :  { %230 = shalt.err (!%p227_p11)
}
  0x55   :  { %101 = dma.vmem_to_hbm [thread:$0]  %s295_s17, 128, %s347_s4, [#allocation9]  }
  0x56   :  { %235 = dma.done.wait [#allocation4], 128  }
  0x57   :  { %236 = vsyncadd [#allocation4], 4294967168 }
  0x58   :  { %237 = dma.done.wait [#allocation9], 256  }
  0x59   :  { %238 = vsyncadd [#allocation9], 4294967040 }
  0x5a   :  { %111 = vsyncpa [#allocation3], 1 }
  0x5b   :  { %112 = vsyncpa [#allocation6], 1 }
  0x5c   :  { %113 = vsyncpa [#allocation4], 1 }
  0x5d   :  { %114 = vsyncpa [#allocation9], 1 }

</bundles_post_ra>
